<compile_context>
chip_gen: v7x
topology: tpu7x:2x2x1
jax: 0.10.0
libtpu: 0.0.40
codegen_flags: <defaults>
</compile_context>

<pallas_src>
import jax
import jax.numpy as jnp
from jax.experimental import pallas as pl
from jax.experimental.pallas import tpu as pltpu


def _round_up(n, m):
    return ((n + m - 1) // m) * m


def _cdiv(a, b):
    return -(-a // b)


def _choose_tiling(B, tb_max=65536):
    """Pick (TB, Bp, ntiles): TB multiple of 128, Bp = TB*ntiles >= B."""
    Bp = _round_up(max(B, 1), 128)
    ntiles = _cdiv(Bp, tb_max)
    # Keep at least 2 grid steps when the batch allows it: enables megacore
    # splitting on v7x and input/output double-buffer pipelining everywhere.
    if ntiles < 2 and Bp >= 2 * 128:
        ntiles = 2
    TB = _round_up(_cdiv(Bp, ntiles), 128)
    Bp = TB * ntiles
    return TB, Bp, ntiles


def simple_nn_kernel(x_ref, w1t_ref, b1t_ref, w2t_ref, b2t_ref, w3t_ref, out_ref):
    # Feature-major tiles: batch is on the lane axis.
    xt = x_ref[...]                                   # (2, TB)  f32
    w1t = w1t_ref[...]                                # (20, 2)

    # fc1 + relu as a VPU broadcast-MAC (K=2 -> MXU would be pure padding).
    h1 = (w1t[:, 0:1] * xt[0:1, :]
          + w1t[:, 1:2] * xt[1:2, :]
          + b1t_ref[...])                             # (20, TB)
    h1 = jnp.maximum(h1, 0.0)

    # dropout(p=0.5) in eval mode == identity

    # fc2 + relu on the MXU (lane dim fully dense; MXU slot otherwise idle).
    h2 = jnp.dot(w2t_ref[...], h1,
                 preferred_element_type=jnp.float32) + b2t_ref[...]   # (10, TB)
    h2 = jnp.maximum(h2, 0.0)

    # output layer (no bias)
    logits = jnp.dot(w3t_ref[...], h2,
                     preferred_element_type=jnp.float32)              # (3, TB)

    # Softmax across the 3 class rows (sublane reduce, per-lane elementwise).
    m = jnp.max(logits, axis=0, keepdims=True)        # (1, TB)
    e = jnp.exp(logits - m)                           # (3, TB)
    inv = pl.reciprocal(jnp.sum(e, axis=0, keepdims=True), approx=False)
    out_ref[...] = e * inv                            # single unmasked store


def simple_nn_forward(x, params, tb_max=65536):
    """x: (B, 2) f32. params are JAX-style (in, out) weights, i.e. the transpose
    of torch.nn.Linear's (out, in) storage. Returns (B, 3) softmax probs."""
    w1, b1, w2, b2, w3 = params
    B = x.shape[0]

    TB, Bp, ntiles = _choose_tiling(B, tb_max)

    # Pad batch to Bp (<= ~128*ntiles extra rows) and go feature-major.
    xp = jnp.pad(x.astype(jnp.float32), ((0, Bp - B), (0, 0)))
    xt = xp.T                         # (2, Bp)   batch on lanes
    w1t, b1t = w1.T, b1.T             # (20, 2), (20, 1)
    w2t, b2t = w2.T, b2.T             # (10, 20), (10, 1)
    w3t = w3.T                        # (3, 10)

    out_t = pl.pallas_call(
        simple_nn_kernel,
        out_shape=jax.ShapeDtypeStruct((3, Bp), jnp.float32),
        grid_spec=pltpu.PrefetchScalarGridSpec(
            num_scalar_prefetch=0,
            grid=(ntiles,),
            in_specs=[
                pl.BlockSpec((2, TB), lambda i: (0, i)),      # x tile (batch on lanes)
                pl.BlockSpec(w1t.shape, lambda i: (0, 0)),    # weights stay resident
                pl.BlockSpec(b1t.shape, lambda i: (0, 0)),
                pl.BlockSpec(w2t.shape, lambda i: (0, 0)),
                pl.BlockSpec(b2t.shape, lambda i: (0, 0)),
                pl.BlockSpec(w3t.shape, lambda i: (0, 0)),
            ],
            out_specs=pl.BlockSpec((3, TB), lambda i: (0, i)),
        ),
        compiler_params=pltpu.CompilerParams(
            dimension_semantics=("parallel",)),               # megacore on v7x
    )(xt, w1t, b1t, w2t, b2t, w3t)

    # NOTE: this final (3, Bp) -> (B, 3) transpose is an HBM layout pass; if the
    # consumer can take feature-major output, return out_t[:, :B] instead.
    return out_t.T[:B]                # (B, 3)


def init_params(key):
    # Deterministic init mimicking torch Linear's U(-1/sqrt(fan_in), 1/sqrt(fan_in)),
    # stored in JAX (in, out) layout.
    k1, k2, k3, k4, k5 = jax.random.split(key, 5)

    def uniform(k, shape, fan_in):
        bound = 1.0 / jnp.sqrt(float(fan_in))
        return jax.random.uniform(k, shape, jnp.float32, -bound, bound)

    w1 = uniform(k1, (2, 20), 2)
    b1 = uniform(k2, (1, 20), 2)
    w2 = uniform(k3, (20, 10), 20)
    b2 = uniform(k4, (1, 10), 20)
    w3 = uniform(k5, (10, 3), 10)
    return (w1, b1, w2, b2, w3)


def reference_forward(x, params):
    # Pure-JAX reference for validation.
    w1, b1, w2, b2, w3 = params
    h1 = jnp.maximum(x @ w1 + b1, 0.0)
    h2 = jnp.maximum(h1 @ w2 + b2, 0.0)
    logits = h2 @ w3
    return jax.nn.softmax(logits, axis=1)


if __name__ == "__main__":
    key = jax.random.PRNGKey(0)
    kx, kx2, kp = jax.random.split(key, 3)
    params = init_params(kp)

    # Small-shape test (single 128-lane tile, padded batch).
    B = 8
    x = jax.random.normal(kx, (B, 2), dtype=jnp.float32)
    out = jax.block_until_ready(simple_nn_forward(x, params))
    ref = reference_forward(x, params)
    assert out.shape == (B, 3), out.shape
    assert jnp.allclose(out, ref, atol=1e-5, rtol=1e-5), (out, ref)
    assert jnp.allclose(jnp.sum(out, axis=1), 1.0, atol=1e-5)

    # Multi-tile test (exercises the adaptive-TB grid + padding path).
    B2 = 1000
    x2 = jax.random.normal(kx2, (B2, 2), dtype=jnp.float32)
    out2 = jax.block_until_ready(simple_nn_forward(x2, params))
    ref2 = reference_forward(x2, params)
    assert out2.shape == (B2, 3), out2.shape
    assert jnp.allclose(out2, ref2, atol=1e-5, rtol=1e-5)
    assert jnp.allclose(jnp.sum(out2, axis=1), 1.0, atol=1e-5)

    print("KERNEL_OK")
</pallas_src>

<mosaic_0001>
module attributes {stable_mosaic.version = 11 : i64} {
  func.func @simple_nn_kernel(%arg0: i32, %arg1: memref<2x128xf32, #tpu.memory_space<vmem>>, %arg2: memref<20x2xf32, #tpu.memory_space<vmem>>, %arg3: memref<20x1xf32, #tpu.memory_space<vmem>>, %arg4: memref<10x20xf32, #tpu.memory_space<vmem>>, %arg5: memref<10x1xf32, #tpu.memory_space<vmem>>, %arg6: memref<3x10xf32, #tpu.memory_space<vmem>>, %arg7: memref<3x128xf32, #tpu.memory_space<vmem>>) attributes {dimension_semantics = [#tpu.dimension_semantics<parallel>], iteration_bounds = array<i64: 1>, scalar_prefetch = 0 : i64, scratch_operands = 0 : i64, tpu.core_type = #tpu.core_type<tc>, window_params = [{transform_indices = @transform_0, window_bounds = array<i64: 2, 128>}, {pipeline_mode = #tpu.pipeline_mode<synchronous>, transform_indices = @transform_1, window_bounds = array<i64: 20, 2>}, {pipeline_mode = #tpu.pipeline_mode<synchronous>, transform_indices = @transform_2, window_bounds = array<i64: 20, 1>}, {pipeline_mode = #tpu.pipeline_mode<synchronous>, transform_indices = @transform_3, window_bounds = array<i64: 10, 20>}, {pipeline_mode = #tpu.pipeline_mode<synchronous>, transform_indices = @transform_4, window_bounds = array<i64: 10, 1>}, {pipeline_mode = #tpu.pipeline_mode<synchronous>, transform_indices = @transform_5, window_bounds = array<i64: 3, 10>}, {transform_indices = @transform_6, window_bounds = array<i64: 3, 128>}]} {
    %c0 = arith.constant 0 : index
    %c0_0 = arith.constant 0 : index
    %0 = vector.load %arg1[%c0, %c0_0] : memref<2x128xf32, #tpu.memory_space<vmem>>, vector<2x128xf32>
    %c0_1 = arith.constant 0 : index
    %c0_2 = arith.constant 0 : index
    %1 = vector.load %arg2[%c0_1, %c0_2] : memref<20x2xf32, #tpu.memory_space<vmem>>, vector<20x2xf32>
    %2 = vector.extract_strided_slice %1 {offsets = [0, 0], sizes = [20, 1], strides = [1, 1]} : vector<20x2xf32> to vector<20x1xf32>
    %3 = vector.extract_strided_slice %0 {offsets = [0, 0], sizes = [1, 128], strides = [1, 1]} : vector<2x128xf32> to vector<1x128xf32>
    %4 = vector.broadcast %2 : vector<20x1xf32> to vector<20x128xf32>
    %5 = vector.broadcast %3 : vector<1x128xf32> to vector<20x128xf32>
    %6 = arith.mulf %4, %5 : vector<20x128xf32>
    %7 = vector.extract_strided_slice %1 {offsets = [0, 1], sizes = [20, 1], strides = [1, 1]} : vector<20x2xf32> to vector<20x1xf32>
    %8 = vector.extract_strided_slice %0 {offsets = [1, 0], sizes = [1, 128], strides = [1, 1]} : vector<2x128xf32> to vector<1x128xf32>
    %9 = vector.broadcast %7 : vector<20x1xf32> to vector<20x128xf32>
    %10 = vector.broadcast %8 : vector<1x128xf32> to vector<20x128xf32>
    %11 = arith.mulf %9, %10 : vector<20x128xf32>
    %12 = arith.addf %6, %11 : vector<20x128xf32>
    %c0_3 = arith.constant 0 : index
    %c0_4 = arith.constant 0 : index
    %13 = vector.load %arg3[%c0_3, %c0_4] : memref<20x1xf32, #tpu.memory_space<vmem>>, vector<20x1xf32>
    %14 = vector.broadcast %13 : vector<20x1xf32> to vector<20x128xf32>
    %15 = arith.addf %12, %14 : vector<20x128xf32>
    %cst = arith.constant 0.000000e+00 : f32
    %16 = vector.broadcast %cst : f32 to vector<20x128xf32>
    %17 = arith.maximumf %15, %16 : vector<20x128xf32>
    %c0_5 = arith.constant 0 : index
    %c0_6 = arith.constant 0 : index
    %18 = vector.load %arg4[%c0_5, %c0_6] : memref<10x20xf32, #tpu.memory_space<vmem>>, vector<10x20xf32>
    %cst_7 = arith.constant dense<0.000000e+00> : vector<10x128xf32>
    %19 = tpu.matmul %18, %17, %cst_7 {dimension_numbers = #tpu.dot_dimension_numbers<[1], [0], [0], [1], [0, 0, 1, 1], [], []>} : vector<10x20xf32>, vector<20x128xf32>, vector<10x128xf32> -> vector<10x128xf32>
    %c0_8 = arith.constant 0 : index
    %c0_9 = arith.constant 0 : index
    %20 = vector.load %arg5[%c0_8, %c0_9] : memref<10x1xf32, #tpu.memory_space<vmem>>, vector<10x1xf32>
    %21 = vector.broadcast %20 : vector<10x1xf32> to vector<10x128xf32>
    %22 = arith.addf %19, %21 : vector<10x128xf32>
    %cst_10 = arith.constant 0.000000e+00 : f32
    %23 = vector.broadcast %cst_10 : f32 to vector<10x128xf32>
    %24 = arith.maximumf %22, %23 : vector<10x128xf32>
    %c0_11 = arith.constant 0 : index
    %c0_12 = arith.constant 0 : index
    %25 = vector.load %arg6[%c0_11, %c0_12] : memref<3x10xf32, #tpu.memory_space<vmem>>, vector<3x10xf32>
    %cst_13 = arith.constant dense<0.000000e+00> : vector<3x128xf32>
    %26 = tpu.matmul %25, %24, %cst_13 {dimension_numbers = #tpu.dot_dimension_numbers<[1], [0], [0], [1], [0, 0, 1, 1], [], []>} : vector<3x10xf32>, vector<10x128xf32>, vector<3x128xf32> -> vector<3x128xf32>
    %cst_14 = arith.constant dense<0xFF800000> : vector<128xf32>
    %27 = vector.multi_reduction <maximumf>, %26, %cst_14 [0] : vector<3x128xf32> to vector<128xf32>
    %28 = vector.shape_cast %27 : vector<128xf32> to vector<1x128xf32>
    %29 = vector.broadcast %28 : vector<1x128xf32> to vector<3x128xf32>
    %30 = arith.subf %26, %29 : vector<3x128xf32>
    %31 = math.exp %30 : vector<3x128xf32>
    %cst_15 = arith.constant dense<0.000000e+00> : vector<128xf32>
    %32 = vector.multi_reduction <add>, %31, %cst_15 [0] : vector<3x128xf32> to vector<128xf32>
    %33 = vector.shape_cast %32 : vector<128xf32> to vector<1x128xf32>
    %34 = tpu.reciprocal %33 : vector<1x128xf32> -> vector<1x128xf32>
    %35 = vector.broadcast %34 : vector<1x128xf32> to vector<3x128xf32>
    %36 = arith.mulf %31, %35 : vector<3x128xf32>
    %c0_16 = arith.constant 0 : index
    %c0_17 = arith.constant 0 : index
    %37 = vector.load %arg7[%c0_16, %c0_17] : memref<3x128xf32, #tpu.memory_space<vmem>>, vector<3x128xf32>
    tpu.vector_store %arg7[%c0_16, %c0_17], %36 {strides = array<i32>} : memref<3x128xf32, #tpu.memory_space<vmem>>, vector<3x128xf32>,
    return
  }
  func.func @transform_0(%arg0: i32) -> (i32, i32) {
    %c0_i32 = arith.constant 0 : i32
    %c0_i32_0 = arith.constant 0 : i32
    return %c0_i32, %arg0 : i32, i32
  }
  func.func @transform_1(%arg0: i32) -> (i32, i32) {
    %c0_i32 = arith.constant 0 : i32
    %c0_i32_0 = arith.constant 0 : i32
    %c0_i32_1 = arith.constant 0 : i32
    return %c0_i32, %c0_i32_0 : i32, i32
  }
  func.func @transform_2(%arg0: i32) -> (i32, i32) {
    %c0_i32 = arith.constant 0 : i32
    %c0_i32_0 = arith.constant 0 : i32
    %c0_i32_1 = arith.constant 0 : i32
    return %c0_i32, %c0_i32_0 : i32, i32
  }
  func.func @transform_3(%arg0: i32) -> (i32, i32) {
    %c0_i32 = arith.constant 0 : i32
    %c0_i32_0 = arith.constant 0 : i32
    %c0_i32_1 = arith.constant 0 : i32
    return %c0_i32, %c0_i32_0 : i32, i32
  }
  func.func @transform_4(%arg0: i32) -> (i32, i32) {
    %c0_i32 = arith.constant 0 : i32
    %c0_i32_0 = arith.constant 0 : i32
    %c0_i32_1 = arith.constant 0 : i32
    return %c0_i32, %c0_i32_0 : i32, i32
  }
  func.func @transform_5(%arg0: i32) -> (i32, i32) {
    %c0_i32 = arith.constant 0 : i32
    %c0_i32_0 = arith.constant 0 : i32
    %c0_i32_1 = arith.constant 0 : i32
    return %c0_i32, %c0_i32_0 : i32, i32
  }
  func.func @transform_6(%arg0: i32) -> (i32, i32) {
    %c0_i32 = arith.constant 0 : i32
    %c0_i32_0 = arith.constant 0 : i32
    return %c0_i32, %arg0 : i32, i32
  }
}

</mosaic_0001>

<bundles_post_ra>
// kernel: tpu_custom_call.1
= control target key start
LH: loop header
LB: loop body
LE: loop exit
PB: predicated region body
PF: predicated region fallthrough
CT: control target
= control target key end

     0   :  { %v389_v1 = vmov 1   ;;  %v390_v2 = vmov 0   ;;  %s481_s0 = inlined_call_operand.vmem [shape: f32[2,128], index: 0, kind: input, shape index: {}]   ;;  %s482_s1 = inlined_call_operand.vmem [shape: f32[20,2], index: 1, kind: input, shape index: {}]   ;;  %s483_s2 = inlined_call_operand.vmem [shape: f32[20,1], index: 2, kind: input, shape index: {}]   ;;  %s484_s3 = inlined_call_operand.vmem [shape: f32[10,20], index: 3, kind: input, shape index: {}]   ;;  %s485_s4 = inlined_call_operand.vmem [shape: f32[10,1], index: 4, kind: input, shape index: {}]   ;;  %s486_s5 = inlined_call_operand.vmem [shape: f32[3,10], index: 5, kind: input, shape index: {}]   ;;  %s487_s6 = inlined_call_operand.hbm [shape: f32[3,128], index: 6, kind: output, shape index: {}]  }
   0x1   :  { %v25_v0 = vld [vmem:[%s482_s1] sm:$0xff]  ;;  %357 = vset.pattern.permute.xlu1 %v389_v1  ;;  %356 = vset.pattern.permute.xlu0 %v390_v2  ;;  %v26_v3 = vld [vmem:[%s482_s1 + $0x8] sm:$0xff] }
   0x2   :  { %51 = vperm.xlu1 %357, %v25_v0   ;;  %30 = vperm.xlu0 %356, %v25_v0  }
   0x3   :  { %11 = vsyncpa [#allocation3], 0  ;;  %v72_v4 = vld [vmem:[%s483_s2] sm:$0xff]  ;;  %v73_v5 = vld [vmem:[%s483_s2 + $0x8] sm:$0xff]  ;;  %vm110_vm0 = vcmask 162816   ;;  %v43_v11 = vlaneseq  ;;  %vm117_vm1 = vcmask 1043456  }
   0x4   :  { %v27_v6 = vld [vmem:[%s482_s1 + $0x10] sm:$0xf]  ;;  %v99_v8 = vld [vmem:[%s485_s4 + $0x8] sm:$0x3]  ;;  %v96_v9 = vld [vmem:[%s484_s3] sm:$0xff]  ;;  %v391_v44 = vmov 0.0|0.0  }
   0x5   :  { %v74_v7 = vld [vmem:[%s483_s2 + $0x10] sm:$0xf]  ;;  %331 = vmatprep.mubr.msk.f32.mxu0 %vm110_vm0, %v96_v9  ;;  %v98_v10 = vld [vmem:[%s485_s4] sm:$0xff]  ;;  %v44_v12 = vshrl.u32 %v43_v11, 7  ;;  %v97_v43 = vld [vmem:[%s484_s3 + $0x8] sm:$0x3]  ;;  %345 = vmatprep.subr.bf16.mxu1 %v391_v44 }
   0x6   :  { %55 = vperm.xlu1 %357, %v26_v3   ;;  %35 = vperm.xlu0 %356, %v26_v3   ;;  %v24_v15 = vld [vmem:[%s481_s0] sm:$0x3]  ;;  %vm392_vm2 = vmmov 0   ;;  %v393_v45 = vmov 0.0   ;;  %vm203_vm3 = vcmask 1041408   ;;  %vm394_vm4 = vmmov 1  }
   0x7   :  { %v64_v13 = vsub.s32 1, %v44_v12  ;;  %v45_v14 = vsub.s32 0, %v44_v12  ;;  %338 = vmatprep.mubr.msk.f32.mxu1 %vm392_vm2, %v393_v45  ;;  %vm347_vm5 = vmpackc.low %vm203_vm3, %vm394_vm4  ;;  %v198_v55 = vld [vmem:[%s486_s5] sm:$0x7]  ;;  %vm199_vm6 = vcmask 80896   ;;  %vm277_vm7 = vcmask 1042432  }
   0x8   :  { %s395_s5 = smov [#allocation2]  }
   0x9   :  { %v65_v16 = vrot.slane %v24_v15, %v64_v13  ;;  %v46_v17 = vrot.slane %v24_v15, %v45_v14  ;;  %s304_s16 = sshll.u32 %s395_s5, 4  ;;  %s305_s16 = int_to_ptr.vmem [resolvable:$true] %s304_s16 }
   0xa   :  { %358 = vset.pattern.permute.xlu1 %v390_v2  ;;  %77 = vperm.xlu0 %356, %v72_v4   ;;  %s365_s17 = scalar_lea.vmem %s305_s16, 64  ;;  %p370_p1 = scmp.lt.s32.totalorder %s305_s16, %s305_s16 }
   0xb   :  { %82 = vperm.xlu1 %358, %v73_v5   ;;  %p366_p0 = scmp.ne.s32.totalorder %s305_s16, %s365_s17  ;;  %p371_p2 = scmp.lt.s32.totalorder %s365_s17, %s365_s17 }
   0xd   :  { %p372_p3 = por %p371_p2, %p370_p1 }
   0xe   :  { %40 = vperm.xlu0 %356, %v27_v6  }
   0xf   :  { %359 = vset.pattern.permute.xlu1 %v389_v1  ;;  %p373_p4 = pnand %p372_p3, %p366_p0 }
  0x10   :  { %59 = vperm.xlu1 %359, %v27_v6  }
  0x12   :  { %87 = vperm.xlu0 %356, %v74_v7  }
  0x14   :  { %360 = vset.pattern.permute.xlu1 %v390_v2 }
  0x15   :  { %102 = vperm.xlu1 %360, %v98_v10  }
  0x16   :  { %107 = vperm.xlu0 %356, %v99_v8  }
  0x81   :  { %v52_v18 = vpop.permute.xlu1 %51  ;;  %v31_v19 = vpop.permute.xlu0 %30 }
  0x82   :  { %v66_v20 = vmul.f32 %v65_v16, %v52_v18  ;;  %v47_v21 = vmul.f32 %v46_v17, %v31_v19 }
  0x84   :  { %v69_v26 = vadd.f32 %v66_v20, %v47_v21 }
  0x85   :  { %v56_v22 = vpop.permute.xlu1 %55  ;;  %v36_v23 = vpop.permute.xlu0 %35 }
  0x86   :  { %v67_v24 = vmul.f32 %v65_v16, %v56_v22  ;;  %v48_v25 = vmul.f32 %v46_v17, %v36_v23 }
  0x88   :  { %v70_v27 = vadd.f32 %v67_v24, %v48_v25 }
  0x89   :  { %v78_v28 = vpop.permute.xlu0 %77 }
  0x8a   :  { %v90_v29 = vadd.f32 %v78_v28, %v69_v26  ;;  %v83_v30 = vpop.permute.xlu1 %82 }
  0x8b   :  { %v91_v31 = vadd.f32 %v83_v30, %v70_v27 }
  0x8c   :  { %v93_v32 = vmax.f32 %v90_v29, 0.0 }
  0x8d   :  { %v94_v33 = vmax.f32 %v91_v31, 0.0  ;;  %v41_v34 = vpop.permute.xlu0 %40 }
  0x8e   :  { %v49_v37 = vmul.f32 %v46_v17, %v41_v34 }
  0x8f   :  { %v60_v35 = vpop.permute.xlu1 %59  ;;  %v341_v36 = vpack.c.bf16 %v94_v33, %v93_v32 }
  0x90   :  { %v68_v38 = vmul.f32 %v65_v16, %v60_v35 }
  0x91   :  { %342 = vmatprep.subr.bf16.mxu0 %v341_v36  ;;  %v88_v40 = vpop.permute.xlu0 %87 }
  0x92   :  { %v71_v39 = vadd.f32 %v68_v38, %v49_v37  ;;  %344 = vmatpush3.bf16.msra.mxu0 %v341_v36 }
  0x94   :  { %v92_v41 = vadd.f32 %v88_v40, %v71_v39  ;;  %v103_v46 = vpop.permute.xlu1 %102 }
  0x95   :  { %v108_v47 = vpop.permute.xlu0 %107 }
  0x96   :  { %v95_v42 = vmax.f32 %v92_v41, 0.0 }
  0x98   :  { %329 = vmatprep.subr.msk.mxu0 %vm117_vm1, %v95_v42 }
  0x99   :  { %330 = vmatpush3.msk.msra.mxu0 %vm117_vm1, %v95_v42 }
  0x9a   :  { %332 = vmatmul.mubr.msk.f32.vlgmr.msra.gmra.mrb[0].mxu0 %vm110_vm0, %v97_v43 }
 0x16d   :  { %v333_v48 = vpop.f32.mrb[0].mxu0 }
 0x16e   :  { %v193_v49 = vadd.f32 %v333_v48, %v108_v47  ;;  %v187_v50 = vpop.f32.mrb[1].mxu0 }
 0x16f   :  { %v188_v51 = vadd.f32 %v187_v50, %v103_v46 }
 0x170   :  { %v197_v52 = vmax.f32 %v193_v49, 0.0 }
 0x171   :  { %v196_v53 = vmax.f32 %v188_v51, 0.0 }
 0x173   :  { %v346_v54 = vpack.c.bf16 %v197_v52, %v196_v53 }
 0x175   :  { %348 = vmatpush3.bf16.msk.msra.mxu1 %vm347_vm5, %v346_v54 }
 0x178   :  { %339 = vmatmul.mubr.msk.f32.vlgmr.msra.gmra.mrb[0].mxu1 %vm199_vm6, %v198_v55 }
 0x24b   :  { %v273_v56 = vpop.f32.mrb[0].mxu1 }
 0x24c   :  { %v278_v57 = vsel %vm277_vm7, %v273_v56, -inf  ;;  %v340_v58 = vpop.f32.mrb[1].mxu1 }
 0x24d   :  { %v279_v59 = vrot.slane %v278_v57, 4 }
 0x24f   :  { %v280_v60 = vmax.f32 %v278_v57, %v279_v59 }
 0x251   :  { %v281_v61 = vrot.slane %v280_v60, 2 }
 0x253   :  { %v282_v62 = vmax.f32 %v280_v60, %v281_v61 }
 0x255   :  { %v283_v63 = vrot.slane %v282_v62, 1 }
 0x257   :  { %v284_v0 = vmax.f32 %v282_v62, %v283_v63 }
 0x259   :  { %v285_v1 = vsub.f32 %v273_v56, %v284_v0 }
 0x25b   :  { %v286_v2 = vmul.f32 1.442695, %v285_v1 }
 0x25d   :  { %361 = vpow2.f32 %v286_v2 }
 0x267   :  { %v362_v3 = vpop.eup %361 }
 0x268   :  { %v288_v4 = vsel %vm277_vm7, %v362_v3, 0.0 }
 0x269   :  { %v289_v5 = vrot.slane %v288_v4, 4 }
 0x26b   :  { %v290_v6 = vadd.f32 %v289_v5, %v288_v4 }
 0x26d   :  { %v291_v7 = vrot.slane %v290_v6, 2 }
 0x26f   :  { %v292_v8 = vadd.f32 %v291_v7, %v290_v6 }
 0x271   :  { %v293_v9 = vrot.slane %v292_v8, 1 }
 0x273   :  { %v294_v10 = vadd.f32 %v293_v9, %v292_v8 }
 0x275   :  { %363 = vrcp.f32 %v294_v10 }
 0x27f   :  { %v364_v11 = vpop.eup %363 }
 0x280   :  { %v296_v12 = vmul.f32 %v364_v11, %v362_v3 }
 0x282   :  { %297 = vst [vmem:[#allocation2] sm:$0x7] %v296_v12 }
 0x283   :  { %376 = shalt.err (!%p373_p4)
}
 0x284   :  { %s377_s20 = scalar_lea.hbm %s487_s6, 64 }
 0x285   :  { %p378_p5 = scmp.ne.s32.totalorder %s487_s6, %s377_s20  ;;  %p381_p6 = scmp.lt.u32.totalorder %s377_s20, %s487_s6 }
 0x287   :  { %p383_p7 = pnand %p381_p6, %p378_p5 }
 0x289   :  { %386 = shalt.err (!%p383_p7)
}
 0x28a   :  { %307 = dma.vmem_to_hbm [thread:$0]  %s305_s16, 64, %s487_s6, [#allocation3]  }
 0x28b   :  { %387 = dma.done.wait [#allocation3], 64  }
 0x28c   :  { %388 = vsyncadd [#allocation3], 4294967232 }
 0x28d   :  { %311 = vsyncpa [#allocation3], 1 }

</bundles_post_ra>
